<compile_context>
chip_gen: v6e
topology: v6e:2x2x1
jax: 0.10.0
libtpu: 0.0.40
codegen_flags: <defaults>
</compile_context>

<pallas_src>
import functools

import jax
import jax.numpy as jnp
from jax import lax
from jax.experimental import pallas as pl
from jax.experimental.pallas import tpu as pltpu

_LANE = 128     # TPU lane width
_SUBLANE = 8    # f32 sublane granularity


def _linear_t_kernel(x_ref, w_ref, o_ref):
    # x_ref : (tile_m, K)      batch tile
    # w_ref : (n_sub, K)       zero-padded weight, VMEM-resident (constant index_map)
    # o_ref : (n_sub, tile_m)  logits^T tile: classes on sublanes, batch on lanes
    o_ref[...] = lax.dot_general(
        w_ref[...],
        x_ref[...],
        dimension_numbers=(((1,), (1,)), ((), ())),  # contract K with K
        preferred_element_type=jnp.float32,
    ).astype(o_ref.dtype)


def prepare_weight(weight, compute_dtype=None):
    """One-time (param-load-time) prep.

    weight: (num_class, K) in the PyTorch nn.Linear convention.
    Returns (n_sub, K) with the class dim zero-padded up to a multiple of 8
    sublanes.  No transpose is needed: the kernel contracts K directly and the
    classes land on the output sublane axis.
    """
    n, k = weight.shape
    n_sub = max(_SUBLANE, pl.cdiv(n, _SUBLANE) * _SUBLANE)
    w_pad = jnp.zeros((n_sub, k), dtype=weight.dtype).at[:n, :].set(weight)
    if compute_dtype is not None:
        # Only the (tiny) weight is cast here.  Do NOT cast x in the wrapper —
        # that would be an extra full HBM pass over x; feed a bf16 x from the
        # producer instead if a bf16 compute path is wanted.
        w_pad = w_pad.astype(compute_dtype)
    return w_pad


def _choose_tile_m(batch, tm):
    """Batch tile: lane-aligned, large, but >=2 grid steps for big batches (v7x)."""
    tm = max(_LANE, pl.cdiv(tm, _LANE) * _LANE)  # lane-align the tile cap
    if batch > tm:
        return tm
    if batch >= 4 * _LANE:
        # Keep at least 2 grid steps so dimension_semantics=("parallel",) can
        # shard the batch axis across the two TensorCores on v7x (no-op on
        # single-TC v5e/v6e).
        return min(tm, pl.cdiv(pl.cdiv(batch, 2), _LANE) * _LANE)
    # Small batch: one block covering the whole batch (block == full array dim).
    return batch


@functools.partial(jax.jit, static_argnames=("num_class", "tm", "transposed"))
def linear_classifier(x, w_padded, *, num_class, tm=1024, transposed=False):
    """x: (B, K), w_padded: (n_sub, K) from prepare_weight.

    Returns (B, num_class) logits (forward semantics of the PyTorch module), or
    (num_class, B) if transposed=True (lets a downstream consumer skip the tiny
    post-kernel transpose entirely).  Padded class rows are never returned.
    """
    B, K = x.shape
    n_sub, Kw = w_padded.shape
    assert K == Kw, "feature dims must match"
    assert n_sub % _SUBLANE == 0 and n_sub >= num_class

    out_dtype = x.dtype
    tile_m = _choose_tile_m(B, tm)
    grid = (pl.cdiv(B, tile_m),)

    # Raise the scoped-VMEM limit only if the double-buffered tiles need it
    # (v5e default is ~16 MiB; v6e/v7x default is 32 MiB).
    vmem_needed = (
        2 * tile_m * K * x.dtype.itemsize
        + 2 * n_sub * tile_m * jnp.dtype(out_dtype).itemsize
        + 2 * n_sub * K * w_padded.dtype.itemsize
    )
    cp_kwargs = dict(dimension_semantics=("parallel",))
    if vmem_needed > 12 * 2**20:
        cp_kwargs["vmem_limit_bytes"] = int(vmem_needed + (4 << 20))

    # NOTE: if num_class or K ever scale to large sizes (vocab-sized heads), add
    # a class-dim grid axis with lane-dense tiles so the resident weight block
    # stays under v7x's smaller VMEM; at (8, 128) it is only a few KiB.
    y_t = pl.pallas_call(
        _linear_t_kernel,
        out_shape=jax.ShapeDtypeStruct((n_sub, B), out_dtype),
        grid_spec=pl.GridSpec(
            grid=grid,
            in_specs=[
                # x: one batch tile per grid step (boundary block masked by Pallas)
                pl.BlockSpec((tile_m, K), lambda i: (i, 0)),
                # weight: constant block index -> stays VMEM-resident, no re-DMA
                pl.BlockSpec((n_sub, K), lambda i: (0, 0)),
            ],
            out_specs=pl.BlockSpec((n_sub, tile_m), lambda i: (0, i)),
        ),
        compiler_params=pltpu.CompilerParams(**cp_kwargs),
    )(x, w_padded)

    if transposed:
        return y_t[:num_class, :]
    # Tiny (num_class, B) slice + transpose — negligible vs. the kernel's traffic.
    return y_t[:num_class, :].T


if __name__ == "__main__":
    in_feature_dim_linear = 128
    num_class = 6
    batch = 8

    key = jax.random.PRNGKey(0)
    k_x, k_w, k_x2 = jax.random.split(key, 3)

    # Deterministic synthetic parameters (shape from nn.Linear(128, 6, bias=False)).
    weight = jax.random.normal(
        k_w, (num_class, in_feature_dim_linear), dtype=jnp.float32
    ) * (1.0 / jnp.sqrt(in_feature_dim_linear))

    x = jax.random.normal(k_x, (batch, in_feature_dim_linear), dtype=jnp.float32)

    # One-time weight prep (outside the hot path).
    w_padded = prepare_weight(weight)

    # Small-batch path (single block).
    y = linear_classifier(x, w_padded, num_class=num_class)
    y = jax.block_until_ready(y)
    y_ref = x @ weight.T
    assert y.shape == (batch, num_class)
    assert jnp.allclose(y, y_ref, atol=1e-5, rtol=1e-5)

    # Larger batch: exercises the tiled (multi-step, "parallel") grid and the
    # Pallas-masked boundary block (1000 % 512 != 0), with no repad of x.
    big_batch = 1000
    x2 = jax.random.normal(
        k_x2, (big_batch, in_feature_dim_linear), dtype=jnp.float32
    )
    y2 = linear_classifier(x2, w_padded, num_class=num_class)
    y2 = jax.block_until_ready(y2)
    y2_ref = x2 @ weight.T
    assert y2.shape == (big_batch, num_class)
    assert jnp.allclose(y2, y2_ref, atol=1e-5, rtol=1e-5)

    print("KERNEL_OK")
</pallas_src>

<mosaic_0001>
module attributes {stable_mosaic.version = 11 : i64} {
  func.func @_linear_t_kernel(%arg0: i32, %arg1: memref<8x128xf32, #tpu.memory_space<vmem>>, %arg2: memref<8x128xf32, #tpu.memory_space<vmem>>, %arg3: memref<8x8xf32, #tpu.memory_space<vmem>>) attributes {dimension_semantics = [#tpu.dimension_semantics<parallel>], iteration_bounds = array<i64: 1>, scalar_prefetch = 0 : i64, scratch_operands = 0 : i64, tpu.core_type = #tpu.core_type<tc>, window_params = [{transform_indices = @transform_0, window_bounds = array<i64: 8, 128>}, {pipeline_mode = #tpu.pipeline_mode<synchronous>, transform_indices = @transform_1, window_bounds = array<i64: 8, 128>}, {transform_indices = @transform_2, window_bounds = array<i64: 8, 8>}]} {
    %c0 = arith.constant 0 : index
    %c0_0 = arith.constant 0 : index
    %0 = vector.load %arg2[%c0, %c0_0] : memref<8x128xf32, #tpu.memory_space<vmem>>, vector<8x128xf32>
    %c0_1 = arith.constant 0 : index
    %c0_2 = arith.constant 0 : index
    %1 = vector.load %arg1[%c0_1, %c0_2] : memref<8x128xf32, #tpu.memory_space<vmem>>, vector<8x128xf32>
    %cst = arith.constant dense<0.000000e+00> : vector<8x8xf32>
    %2 = tpu.matmul %0, %1, %cst {dimension_numbers = #tpu.dot_dimension_numbers<[1], [1], [0], [0], [0, 0, 1, 0], [], []>} : vector<8x128xf32>, vector<8x128xf32>, vector<8x8xf32> -> vector<8x8xf32>
    %c0_3 = arith.constant 0 : index
    %c0_4 = arith.constant 0 : index
    %3 = vector.load %arg3[%c0_3, %c0_4] : memref<8x8xf32, #tpu.memory_space<vmem>>, vector<8x8xf32>
    tpu.vector_store %arg3[%c0_3, %c0_4], %2 {strides = array<i32>} : memref<8x8xf32, #tpu.memory_space<vmem>>, vector<8x8xf32>,
    return
  }
  func.func @transform_0(%arg0: i32) -> (i32, i32) {
    %c0_i32 = arith.constant 0 : i32
    %c0_i32_0 = arith.constant 0 : i32
    return %arg0, %c0_i32 : i32, i32
  }
  func.func @transform_1(%arg0: i32) -> (i32, i32) {
    %c0_i32 = arith.constant 0 : i32
    %c0_i32_0 = arith.constant 0 : i32
    %c0_i32_1 = arith.constant 0 : i32
    return %c0_i32, %c0_i32_0 : i32, i32
  }
  func.func @transform_2(%arg0: i32) -> (i32, i32) {
    %c0_i32 = arith.constant 0 : i32
    %c0_i32_0 = arith.constant 0 : i32
    return %c0_i32, %arg0 : i32, i32
  }
}

</mosaic_0001>

<bundles_post_ra>
// kernel: linear_classifier.1
= control target key start
LH: loop header
LB: loop body
LE: loop exit
PB: predicated region body
PF: predicated region fallthrough
CT: control target
= control target key end

     0   :  { %7 = vsyncpa [#allocation3], 0  ;;  %s198_s0 = inlined_call_operand.hbm [shape: f32[8,128], index: 0, kind: input, shape index: {}]   ;;  %s199_s1 = inlined_call_operand.hbm [shape: f32[8,128], index: 1, kind: input, shape index: {}]   ;;  %s200_s2 = inlined_call_operand.vmem [shape: f32[8,8], index: 2, kind: output, shape index: {}]  }
   0x1   :  { %8 = vsyncpa [#allocation5], 0  ;;  %s170_s9 = smov [#allocation2]   ;;  %s171_s11 = smov [#allocation4]  }
   0x2   :  { %s15_s10 = sshll.u32 %s170_s9, 4  ;;  %s25_s12 = sshll.u32 %s171_s11, 4  ;;  %s16_s10 = int_to_ptr.vmem [resolvable:$true] %s15_s10  ;;  %s26_s12 = int_to_ptr.vmem [resolvable:$true] %s25_s12 }
   0x3   :  { %s134_s13 = scalar_lea.vmem %s16_s10, 128  ;;  %p139_p1 = scmp.lt.s32.totalorder %s16_s10, %s16_s10 }
   0x4   :  { %p135_p0 = scmp.ne.s32.totalorder %s16_s10, %s134_s13  ;;  %p140_p2 = scmp.lt.s32.totalorder %s134_s13, %s134_s13 }
   0x6   :  { %p141_p3 = por %p140_p2, %p139_p1 }
   0x8   :  { %p142_p4 = pnand %p141_p3, %p135_p0 }
   0xa   :  { %145 = shalt.err (!%p142_p4)
}
   0xb   :  { %18 = dma.hbm_to_vmem [thread:$0]  %s198_s0, 128, %s16_s10, [#allocation3]  }
   0xc   :  { %s154_s16 = scalar_lea.vmem %s26_s12, 128  ;;  %p159_p6 = scmp.lt.s32.totalorder %s26_s12, %s26_s12 }
   0xd   :  { %p155_p5 = scmp.ne.s32.totalorder %s26_s12, %s154_s16  ;;  %p160_p7 = scmp.lt.s32.totalorder %s154_s16, %s154_s16 }
   0xf   :  { %p161_p8 = por %p160_p7, %p159_p6 }
  0x11   :  { %p162_p9 = pnand %p161_p8, %p155_p5 }
  0x13   :  { %165 = shalt.err (!%p162_p9)
}
  0x14   :  { %28 = dma.hbm_to_vmem [thread:$0]  %s199_s1, 128, %s26_s12, [#allocation5]  }
  0x15   :  { %166 = dma.done.wait [#allocation3], 128  }
  0x16   :  { %167 = vsyncadd [#allocation3], 4294967168 }
  0x17   :  { %168 = dma.done.wait [#allocation5], 128  }
  0x18   :  { %169 = vsyncadd [#allocation5], 4294967168  ;;  %v172_v0 = vmov 0.0   ;;  %vm173_vm0 = vmmov 0   ;;  %v36_v1 = vld [vmem:[#allocation2] sm:$0xff]  ;;  %v35_v2 = vld [vmem:[#allocation4] sm:$0xff] }
  0x19   :  { %117 = vmatprep.subr.mxu0 %v172_v0  ;;  %119 = vmatprep.mubr.msk.f32.mxu0 %vm173_vm0, %v172_v0  ;;  %vm107_vm1 = vcmask 64512  }
  0x1a   :  { %118 = vmatpush3.xpose.msra.mxu0 %v36_v1 }
  0x1d   :  { %120 = vmatmul.mubr.f32.vlgmr.msra.gmra.mxu0 %v35_v2 }
  0xdd   :  { %v103_v3 = vpop.f32.mrf.mxu0 }
  0xde   :  { %108 = vst.msk [vmem:[%s200_s2] sm:$0xff] %vm107_vm1, %v103_v3 }
  0xdf   :  { %v121_v4 = vpop.f32.mrf.mxu0 }
  0xe0   :  { %113 = vsyncpa [#allocation3], 1 }
  0xe1   :  { %114 = vsyncpa [#allocation5], 1 }

</bundles_post_ra>
